<compile_context>
chip_gen: v6e
topology: v6e:2x2x1
jax: 0.10.0
libtpu: 0.0.40
codegen_flags: <defaults>
</compile_context>

<pallas_src>
import functools

import jax
import jax.numpy as jnp
from jax.experimental import pallas as pl
from jax.experimental.pallas import tpu as pltpu


# Cap on lane chunks per spatial tile (bounds the unrolled add loop and the
# per-buffer DMA size at 16384 lanes).
_MAX_LANE_CHUNKS = 128


# ----------------------------------------------------------------------------
# Kernel 1: global average pool over the flattened spatial axis.
#   x: (N, C, HW) -> theta: (N, C) = mean_hw(x)
# ----------------------------------------------------------------------------
def _pool_kernel(x_ref, theta_ref, acc_ref, *, inv_hw, hw, tile_hw, num_hw_tiles):
    def accumulate(n_valid):
        # Sum the first `n_valid` lanes of this spatial tile into acc_ref with
        # pure VPU adds on lane-aligned 128-wide chunks. Load + cast per chunk
        # (no full-tile f32 temp); pairwise adds halve the serial acc chain.
        n_full = n_valid // 128
        rem = n_valid - n_full * 128
        if n_full:
            acc = acc_ref[...]
            j = 0
            while j + 1 < n_full:
                pair = (x_ref[:, :, j * 128:(j + 1) * 128].astype(jnp.float32)
                        + x_ref[:, :, (j + 1) * 128:(j + 2) * 128].astype(jnp.float32))
                acc = acc + pair
                j += 2
            if j < n_full:
                acc = acc + x_ref[:, :, j * 128:(j + 1) * 128].astype(jnp.float32)
            acc_ref[...] = acc
        if rem:
            # Tail chunk (< 128 lanes): reduce it and fold into lane 0.
            part = x_ref[:, :, n_full * 128:n_full * 128 + rem].astype(jnp.float32)
            acc_ref[:, :, 0:1] = acc_ref[:, :, 0:1] + jnp.sum(part, axis=-1,
                                                              keepdims=True)

    def finalize():
        # Single cross-lane (XLU) reduce + mean scale, once per output tile.
        theta_ref[...] = (jnp.sum(acc_ref[...], axis=-1) * inv_hw
                          ).astype(theta_ref.dtype)

    if num_hw_tiles == 1:
        # Full-extent spatial block: no accumulation across grid steps.
        acc_ref[...] = jnp.zeros_like(acc_ref)
        accumulate(hw)
        finalize()
    else:
        k = pl.program_id(2)

        @pl.when(k == 0)
        def _init():
            acc_ref[...] = jnp.zeros_like(acc_ref)

        tail = hw - (num_hw_tiles - 1) * tile_hw  # valid lanes in the last tile
        if tail == tile_hw:
            accumulate(tile_hw)
        else:
            @pl.when(k < num_hw_tiles - 1)
            def _body():
                accumulate(tile_hw)

            @pl.when(k == num_hw_tiles - 1)
            def _tail():
                accumulate(tail)

        @pl.when(k == num_hw_tiles - 1)
        def _fin():
            finalize()


# ----------------------------------------------------------------------------
# Kernel 2: tiny fc1 + ReLU + fc2 + (2*sigmoid - 1) epilogue on pooled theta.
# ----------------------------------------------------------------------------
def _fc_kernel(theta_ref, w1_ref, b1_ref, w2_ref, b2_ref, out_ref):
    h = jnp.dot(theta_ref[...], w1_ref[...],
                preferred_element_type=jnp.float32) + b1_ref[...]
    h = jnp.maximum(h, 0.0)
    o = jnp.dot(h, w2_ref[...],
                preferred_element_type=jnp.float32) + b2_ref[...]
    out_ref[...] = 2.0 * jax.nn.sigmoid(o) - 1.0


# ----------------------------------------------------------------------------
# Wrapper
# ----------------------------------------------------------------------------
def prepare_params(w1, b1, w2, b2):
    """Hoist weight transposes / casts out of the per-call path (run once)."""
    w1_t = jnp.transpose(w1).astype(jnp.float32)           # (C, hidden)
    w2_t = jnp.transpose(w2).astype(jnp.float32)           # (hidden, 2k)
    b1_2d = b1.reshape(1, -1).astype(jnp.float32)           # (1, hidden)
    b2_2d = b2.reshape(1, -1).astype(jnp.float32)           # (1, 2k)
    return w1_t, b1_2d, w2_t, b2_2d


def _vmem_limit_bytes():
    """Generation-aware scoped-VMEM limit (v5e/v6e: 128 MiB phys, v7x: 64)."""
    try:
        phys = int(pltpu.get_tpu_info().vmem_capacity_bytes)
    except Exception:
        phys = 64 * 1024 * 1024      # conservative: assume smallest (v7x/TC)
    return min((phys * 3) // 4, 100 * 1024 * 1024)


def dynamic_relu_coeff(x, w1_t, b1_2d, w2_t, b2_2d, *, max_lanes_cap=None):
    """DynamicReLU.relu_coeff. x: (N, C, L) for '1d' or (N, C, H, W) for '2d'."""
    n, c = x.shape[0], x.shape[1]
    hw = 1
    for d in x.shape[2:]:
        hw *= d
    x_flat = x.reshape(n, c, hw)
    itemsize = x_flat.dtype.itemsize
    hidden = w1_t.shape[1]
    out_dim = w2_t.shape[1]

    # --- tiling -----------------------------------------------------------
    tile_n = n if n <= 8 else 8          # output 2nd-last dim: ==n or 8-mult
    tile_c = c if c < 256 else 128       # channel split (parallel) at large C
    n_tiles = -(-n // tile_n)
    c_tiles = -(-c // tile_c)

    vmem_limit = _vmem_limit_bytes()
    acc_bytes = tile_n * tile_c * 128 * 4
    # Per-input-buffer budget: account for double buffering + acc scratch.
    per_buf = max(128 * tile_n * tile_c * itemsize,
                  min(16 * 1024 * 1024,
                      (vmem_limit - 2 * acc_bytes - (2 << 20)) // 2))
    max_lanes = min(_MAX_LANE_CHUNKS * 128,
                    max(128, per_buf // (tile_n * tile_c * itemsize)))
    if max_lanes_cap is not None:
        max_lanes = min(max_lanes, max_lanes_cap)

    if hw <= max_lanes:
        # Full-extent spatial block: exempt from 128-divisibility, no padding,
        # no masking, no hw reduction axis work.
        tile_hw, num_hw_tiles = hw, 1
    else:
        tile_hw = (max_lanes // 128) * 128
        num_hw_tiles = -(-hw // tile_hw)   # tail handled in-kernel

    grid = (n_tiles, c_tiles, num_hw_tiles)

    pool = functools.partial(_pool_kernel, inv_hw=1.0 / float(hw), hw=hw,
                             tile_hw=tile_hw, num_hw_tiles=num_hw_tiles)
    pool_cost = pl.CostEstimate(
        flops=int(n) * int(c) * int(hw),
        transcendentals=0,
        bytes_accessed=int(n) * int(c) * int(hw) * int(itemsize) + int(n) * int(c) * 4,
    )

    theta = pl.pallas_call(
        pool,
        out_shape=jax.ShapeDtypeStruct((n, c), jnp.float32),
        grid_spec=pltpu.PrefetchScalarGridSpec(
            num_scalar_prefetch=0,
            grid=grid,
            in_specs=[pl.BlockSpec((tile_n, tile_c, tile_hw),
                                   lambda i, j, k: (i, j, k))],
            out_specs=pl.BlockSpec((tile_n, tile_c), lambda i, j, k: (i, j)),
            scratch_shapes=[pltpu.VMEM((tile_n, tile_c, 128), jnp.float32)],
        ),
        compiler_params=pltpu.CompilerParams(
            dimension_semantics=("parallel", "parallel", "arbitrary"),
            vmem_limit_bytes=vmem_limit,
        ),
        cost_estimate=pool_cost,
    )(x_flat)

    # Tiny fc1/fc2 + sigmoid epilogue (single-shot; negligible cost).
    tile_ne = n if n <= 256 else 256
    fc_cost = pl.CostEstimate(
        flops=2 * int(n) * (int(c) * int(hidden) + int(hidden) * int(out_dim)),
        transcendentals=int(n) * int(out_dim),
        bytes_accessed=4 * (int(n) * int(c) + int(c) * int(hidden) + int(hidden)
                            + int(hidden) * int(out_dim) + int(out_dim)
                            + int(n) * int(out_dim)),
    )
    out = pl.pallas_call(
        _fc_kernel,
        out_shape=jax.ShapeDtypeStruct((n, out_dim), jnp.float32),
        grid_spec=pltpu.PrefetchScalarGridSpec(
            num_scalar_prefetch=0,
            grid=(-(-n // tile_ne),),
            in_specs=[
                pl.BlockSpec((tile_ne, c), lambda i: (i, 0)),
                pl.BlockSpec((c, hidden), lambda i: (0, 0)),
                pl.BlockSpec((1, hidden), lambda i: (0, 0)),
                pl.BlockSpec((hidden, out_dim), lambda i: (0, 0)),
                pl.BlockSpec((1, out_dim), lambda i: (0, 0)),
            ],
            out_specs=pl.BlockSpec((tile_ne, out_dim), lambda i: (i, 0)),
        ),
        compiler_params=pltpu.CompilerParams(
            dimension_semantics=("parallel",),
        ),
        cost_estimate=fc_cost,
    )(theta, w1_t, b1_2d, w2_t, b2_2d)

    return out


def reference_coeff(x_nchw, w1, b1, w2, b2):
    theta = jnp.mean(x_nchw, axis=-1)
    theta = jnp.mean(theta, axis=-1)               # (N, C)
    theta = theta @ w1.T + b1
    theta = jnp.maximum(theta, 0.0)
    theta = theta @ w2.T + b2
    return 2.0 * jax.nn.sigmoid(theta) - 1.0


if __name__ == "__main__":
    # Module config
    channels, k, reduction = 8, 2, 4
    hidden = channels // reduction          # 2
    out_dim = 2 * k                         # 4

    key = jax.random.PRNGKey(0)
    kx, k1, k2, k3, k4, kx2, kx3 = jax.random.split(key, 7)

    bound1 = 1.0 / jnp.sqrt(channels)
    w1 = jax.random.uniform(k1, (hidden, channels), jnp.float32, -bound1, bound1)
    b1 = jax.random.uniform(k2, (hidden,), jnp.float32, -bound1, bound1)
    bound2 = 1.0 / jnp.sqrt(hidden)
    w2 = jax.random.uniform(k3, (out_dim, hidden), jnp.float32, -bound2, bound2)
    b2 = jax.random.uniform(k4, (out_dim,), jnp.float32, -bound2, bound2)

    # Registered buffers (unused by relu_coeff; forward is NotImplementedError).
    lambdas = jnp.array([1.0] * k + [0.5] * k, jnp.float32)
    init_v = jnp.array([1.0] + [0.0] * (2 * k - 1), jnp.float32)

    params = prepare_params(w1, b1, w2, b2)   # transposes hoisted, done once

    # Test 1: main shape (2, 8, 16, 16) -> full-extent spatial block path.
    x = jax.random.normal(kx, (2, channels, 16, 16), jnp.float32)
    out = jax.block_until_ready(dynamic_relu_coeff(x, *params))
    ref = reference_coeff(x, w1, b1, w2, b2)
    assert out.shape == (2, out_dim)
    assert jnp.allclose(out, ref, atol=1e-5, rtol=1e-4), "mismatch (16x16)"

    # Test 2: non-128-aligned spatial size (7x7) -> full-extent block, no pad.
    x2 = jax.random.normal(kx2, (2, channels, 7, 7), jnp.float32)
    out2 = jax.block_until_ready(dynamic_relu_coeff(x2, *params))
    ref2 = reference_coeff(x2, w1, b1, w2, b2)
    assert jnp.allclose(out2, ref2, atol=1e-5, rtol=1e-4), "mismatch (7x7)"

    # Test 3: force the multi-tile spatial reduction path (accumulator + when).
    x3 = jax.random.normal(kx3, (2, channels, 16, 32), jnp.float32)
    out3 = jax.block_until_ready(
        dynamic_relu_coeff(x3, *params, max_lanes_cap=128))
    ref3 = reference_coeff(x3, w1, b1, w2, b2)
    assert jnp.allclose(out3, ref3, atol=1e-5, rtol=1e-4), "mismatch (tiled)"

    print("KERNEL_OK")
</pallas_src>

<mosaic_0001>
module attributes {stable_mosaic.version = 11 : i64} {
  func.func @_pool_kernel(%arg0: i32, %arg1: i32, %arg2: i32, %arg3: memref<2x8x256xf32, #tpu.memory_space<vmem>>, %arg4: memref<2x8xf32, #tpu.memory_space<vmem>>, %arg5: memref<2x8x128xf32, #tpu.memory_space<vmem>>) attributes {dimension_semantics = [#tpu.dimension_semantics<parallel>, #tpu.dimension_semantics<parallel>, #tpu.dimension_semantics<arbitrary>], iteration_bounds = array<i64: 1, 1, 1>, scalar_prefetch = 0 : i64, scratch_operands = 1 : i64, tpu.core_type = #tpu.core_type<tc>, window_params = [{transform_indices = @transform_0, window_bounds = array<i64: 2, 8, 256>}, {transform_indices = @transform_1, window_bounds = array<i64: 2, 8>}]} {
    %cst = arith.constant 0.000000e+00 : f32
    %0 = vector.broadcast %cst : f32 to vector<2x8x128xf32>
    %c0 = arith.constant 0 : index
    %c0_0 = arith.constant 0 : index
    %c0_1 = arith.constant 0 : index
    %1 = vector.load %arg5[%c0, %c0_0, %c0_1] : memref<2x8x128xf32, #tpu.memory_space<vmem>>, vector<2x8x128xf32>
    tpu.vector_store %arg5[%c0, %c0_0, %c0_1], %0 {strides = array<i32>} : memref<2x8x128xf32, #tpu.memory_space<vmem>>, vector<2x8x128xf32>,
    %c0_2 = arith.constant 0 : index
    %c0_3 = arith.constant 0 : index
    %c0_4 = arith.constant 0 : index
    %2 = vector.load %arg5[%c0_2, %c0_3, %c0_4] : memref<2x8x128xf32, #tpu.memory_space<vmem>>, vector<2x8x128xf32>
    %c0_5 = arith.constant 0 : index
    %c0_6 = arith.constant 0 : index
    %c0_7 = arith.constant 0 : index
    %3 = vector.load %arg3[%c0_5, %c0_6, %c0_7] : memref<2x8x256xf32, #tpu.memory_space<vmem>>, vector<2x8x128xf32>
    %c0_8 = arith.constant 0 : index
    %c0_9 = arith.constant 0 : index
    %c128 = arith.constant 128 : index
    %4 = vector.load %arg3[%c0_8, %c0_9, %c128] : memref<2x8x256xf32, #tpu.memory_space<vmem>>, vector<2x8x128xf32>
    %5 = arith.addf %3, %4 : vector<2x8x128xf32>
    %6 = arith.addf %2, %5 : vector<2x8x128xf32>
    %c0_10 = arith.constant 0 : index
    %c0_11 = arith.constant 0 : index
    %c0_12 = arith.constant 0 : index
    %7 = vector.load %arg5[%c0_10, %c0_11, %c0_12] : memref<2x8x128xf32, #tpu.memory_space<vmem>>, vector<2x8x128xf32>
    tpu.vector_store %arg5[%c0_10, %c0_11, %c0_12], %6 {strides = array<i32>} : memref<2x8x128xf32, #tpu.memory_space<vmem>>, vector<2x8x128xf32>,
    %c0_13 = arith.constant 0 : index
    %c0_14 = arith.constant 0 : index
    %c0_15 = arith.constant 0 : index
    %8 = vector.load %arg5[%c0_13, %c0_14, %c0_15] : memref<2x8x128xf32, #tpu.memory_space<vmem>>, vector<2x8x128xf32>
    %cst_16 = arith.constant dense<0.000000e+00> : vector<2x8xf32>
    %9 = vector.multi_reduction <add>, %8, %cst_16 [2] : vector<2x8x128xf32> to vector<2x8xf32>
    %cst_17 = arith.constant 3.906250e-03 : f32
    %10 = vector.broadcast %cst_17 : f32 to vector<2x8xf32>
    %11 = arith.mulf %9, %10 : vector<2x8xf32>
    %c0_18 = arith.constant 0 : index
    %c0_19 = arith.constant 0 : index
    %12 = vector.load %arg4[%c0_18, %c0_19] : memref<2x8xf32, #tpu.memory_space<vmem>>, vector<2x8xf32>
    tpu.vector_store %arg4[%c0_18, %c0_19], %11 {strides = array<i32>} : memref<2x8xf32, #tpu.memory_space<vmem>>, vector<2x8xf32>,
    return
  }
  func.func @transform_0(%arg0: i32, %arg1: i32, %arg2: i32) -> (i32, i32, i32) {
    %c0_i32 = arith.constant 0 : i32
    return %arg0, %arg1, %arg2 : i32, i32, i32
  }
  func.func @transform_1(%arg0: i32, %arg1: i32, %arg2: i32) -> (i32, i32) {
    %c0_i32 = arith.constant 0 : i32
    return %arg0, %arg1 : i32, i32
  }
}

</mosaic_0001>

<bundles_post_ra>
// kernel: tpu_custom_call.1
= control target key start
LH: loop header
LB: loop body
LE: loop exit
PB: predicated region body
PF: predicated region fallthrough
CT: control target
= control target key end

     0   :  { %6 = vsyncpa [#allocation4], 0  ;;  %s145_s0 = inlined_call_operand.hbm [shape: f32[2,8,256], index: 0, kind: input, shape index: {}]   ;;  %s146_s1 = inlined_call_operand.hbm [shape: f32[2,8], index: 1, kind: output, shape index: {}]  }
   0x1   :  { %7 = vsyncpa [#allocation5], 0  ;;  %s125_s6 = smov [#allocation3]  }
   0x2   :  { %s13_s7 = sshll.u32 %s125_s6, 4  ;;  %s14_s7 = int_to_ptr.vmem [resolvable:$true] %s13_s7 }
   0x3   :  { %s89_s8 = scalar_lea.vmem %s14_s7, 512  ;;  %p94_p1 = scmp.lt.s32.totalorder %s14_s7, %s14_s7 }
   0x4   :  { %p90_p0 = scmp.ne.s32.totalorder %s14_s7, %s89_s8  ;;  %p95_p2 = scmp.lt.s32.totalorder %s89_s8, %s89_s8 }
   0x6   :  { %p96_p3 = por %p95_p2, %p94_p1 }
   0x8   :  { %p97_p4 = pnand %p96_p3, %p90_p0 }
   0xa   :  { %100 = shalt.err (!%p97_p4)
}
   0xb   :  { %s126_s9 = smov 256   ;;  %s127_s10 = smov 16  }
   0xc   :  { %19 = dma.hbm_to_vmem [thread:$0]  %s145_s0, 512, %s14_s7, [#allocation4], %s126_s9, %s126_s9, %s127_s10  }
   0xd   :  { %121 = dma.done.wait [#allocation4], 512  }
   0xe   :  { %122 = vsyncadd [#allocation4], 4294966784  ;;  %v27_v0 = vld [vmem:[#allocation3] sm:$0xff]  ;;  %v29_v1 = vld [vmem:[#allocation3 + $0x8] sm:$0xff]  ;;  %v47_v6 = vlaneseq  ;;  %s128_s13 = smov [#allocation6]   ;;  %vm57_vm0 = vcmask 1041409  }
   0xf   :  { %v28_v2 = vld [vmem:[#allocation3 + $0x10] sm:$0xff]  ;;  %v31_v3 = vadd.f32 %v29_v1, %v27_v0  ;;  %v30_v4 = vld [vmem:[#allocation3 + $0x18] sm:$0xff]  ;;  %s68_s0 = sshll.u32 %s128_s13, 4  ;;  %vm60_vm1 = vcmask 58368   ;;  %s69_s0 = int_to_ptr.vmem [resolvable:$true] %s68_s0 }
  0x10   :  { %v32_v5 = vadd.f32 %v30_v4, %v28_v2  ;;  %v48_v7 = vand.u32 127, %v47_v6  ;;  %v50_v8 = vshrl.u32 %v47_v6, 7  ;;  %s101_s14 = scalar_lea.vmem %s69_s0, 32  ;;  %p106_p6 = scmp.lt.s32.totalorder %s69_s0, %s69_s0 }
  0x11   :  { %39 = vadd.xlane.f32.xlu0 %v31_v3  ;;  %p102_p5 = scmp.ne.s32.totalorder %s69_s0, %s101_s14  ;;  %p107_p7 = scmp.lt.s32.totalorder %s101_s14, %s101_s14 }
  0x12   :  { %v51_v10 = vsub.s32 %v48_v7, %v50_v8 }
  0x13   :  { %p108_p8 = por %p107_p7, %p106_p6 }
  0x15   :  { %41 = vadd.xlane.f32.xlu0 %v32_v5  ;;  %p109_p9 = pnand %p108_p8, %p102_p5 }
  0x9a   :  { %v40_v9 = vpop.xlane.xlu0 %39 }
  0x9b   :  { %v43_v11 = vmul.f32 0.00390625, %v40_v9 }
  0x9d   :  { %v52_v14 = vrot.slane %v43_v11, %v51_v10 }
  0x9e   :  { %v42_v12 = vpop.xlane.xlu0 %41 }
  0x9f   :  { %v44_v13 = vmul.f32 0.00390625, %v42_v12 }
  0xa1   :  { %v56_v15 = vrot.slane %v44_v13, %v51_v10 }
  0xa3   :  { %v58_v16 = vsel %vm57_vm0, %v56_v15, %v52_v14 }
  0xa4   :  { %61 = vst.msk [vmem:[#allocation6] sm:$0x3] %vm60_vm1, %v58_v16 }
  0xa5   :  { %112 = shalt.err (!%p109_p9)
}
  0xa6   :  { %71 = dma.vmem_to_hbm [thread:$0]  %s69_s0, 32, %s146_s1, [#allocation5]  }
  0xa7   :  { %123 = dma.done.wait [#allocation5], 32  }
  0xa8   :  { %124 = vsyncadd [#allocation5], 4294967264 }
  0xa9   :  { %75 = vsyncpa [#allocation4], 1 }
  0xaa   :  { %76 = vsyncpa [#allocation5], 1 }

</bundles_post_ra>
